<compile_context>
chip_gen: v7x
topology: tpu7x:2x2x1
jax: 0.10.0
libtpu: 0.0.40
codegen_flags: <defaults>
</compile_context>

<pallas_src>
import jax
import jax.numpy as jnp
from jax import lax
from jax.experimental import pallas as pl
from jax.experimental.pallas import tpu as pltpu

TAU = 2.0        # MultiStepLIFNode tau
SCALE = 0.125    # self.scale in the module
BN_EPS = 1e-5    # PyTorch BatchNorm1d default eps
PREC = lax.Precision.HIGHEST


# ----------------------------------------------------------------------------
# Parameters (deterministic, synthetic) + eval-mode BN folding
# ----------------------------------------------------------------------------
def make_params(key, dim):
    keys = jax.random.split(key, 24)
    it = iter(keys)
    p = {}
    for name in ("q", "k", "v", "proj"):
        p[f"w_{name}"] = jax.random.normal(next(it), (dim, dim), jnp.float32) / jnp.sqrt(dim)
        p[f"b_{name}"] = 0.1 * jax.random.normal(next(it), (dim,), jnp.float32)
        p[f"g_{name}"] = 1.0 + 0.2 * jax.random.normal(next(it), (dim,), jnp.float32)   # gamma
        p[f"be_{name}"] = 0.1 * jax.random.normal(next(it), (dim,), jnp.float32)        # beta
        p[f"m_{name}"] = 0.1 * jax.random.normal(next(it), (dim,), jnp.float32)         # running mean
        p[f"v_{name}"] = jax.random.uniform(next(it), (dim,), jnp.float32,
                                            minval=0.5, maxval=1.5)                     # running var
    return p


def fold_params(params):
    """Fold eval-mode BatchNorm1d into the preceding Linear:  Linear+BN(x) == x @ W' + h'.
    (Mathematically identical to (x @ W + b) * gamma/sqrt(var+eps) + (beta - mean*scale).)"""
    f = {}
    for name in ("q", "k", "v", "proj"):
        scale = params[f"g_{name}"] / jnp.sqrt(params[f"v_{name}"] + BN_EPS)
        shift = params[f"be_{name}"] - params[f"m_{name}"] * scale
        f[f"w_{name}"] = params[f"w_{name}"] * scale[None, :]
        f[f"h_{name}"] = params[f"b_{name}"] * scale + shift
    return f


# ----------------------------------------------------------------------------
# Pallas kernel
# ----------------------------------------------------------------------------
def ssa_pallas(x, params, num_heads, batch_block=1):
    T, B, N, C = x.shape
    H = num_heads
    D = C // H
    BB = batch_block
    assert B % BB == 0, "batch_block must divide B"
    assert D <= 256, "bf16 attention-count path requires D <= 256 (exact counts in bf16)"
    R = BB * N                                   # token rows handled per grid step

    fp = fold_params(params)
    # Fuse Q/K/V into a single (C, 3C) projection (BN already folded in).
    w_qkv = jnp.concatenate([fp["w_q"], fp["w_k"], fp["w_v"]], axis=1)        # (C, 3C)
    h_qkv = jnp.concatenate([fp["h_q"], fp["h_k"], fp["h_v"]], axis=0)[None]  # (1, 3C)
    w_p = fp["w_proj"]                                                        # (C, C)
    h_p = fp["h_proj"][None]                                                  # (1, C)

    x_flat = x.reshape(T, B * N, C)

    def kernel(x_ref, wqkv_ref, hqkv_ref, wp_ref, hp_ref,
               out_ref, vout_ref, qkv_mem, a_mem, p_mem):
        t = pl.program_id(1)

        # Reset LIF membrane potentials at t == 0 for every batch block
        # (state is carried across the sequential T axis in VMEM scratch).
        @pl.when(t == 0)
        def _init():
            qkv_mem[...] = jnp.zeros_like(qkv_mem)
            a_mem[...] = jnp.zeros_like(a_mem)
            p_mem[...] = jnp.zeros_like(p_mem)

        def lif(inp, mem_ref, thresh):
            # spikingjelly LIF: v = v + (x - (v - v_reset)) / tau ; hard reset to 0.
            vm = mem_ref[...] + (inp - mem_ref[...]) * (1.0 / TAU)
            spike = (vm >= thresh).astype(jnp.float32)
            mem_ref[...] = vm * (1.0 - spike)
            return spike

        xt = x_ref[0]                                              # (R, C)

        # Fused Q/K/V projection (+ folded BN) and one fused LIF over (R, 3C).
        y_qkv = jnp.dot(xt, wqkv_ref[...], preferred_element_type=jnp.float32,
                        precision=PREC) + hqkv_ref[...]
        qkv_sp = lif(y_qkv, qkv_mem, 1.0)                          # (R, 3C) 0/1 spikes

        v_sp = qkv_sp[:, 2 * C:3 * C]                              # (R, C)
        vout_ref[0] = v_sp                                         # lane-dense store

        # Spikes are exact in bf16 -> single-pass MXU matmuls for the attention core.
        q3 = qkv_sp[:, 0:C].reshape(BB, N, C).astype(jnp.bfloat16)
        k3 = qkv_sp[:, C:2 * C].reshape(BB, N, C).astype(jnp.bfloat16)
        v3 = v_sp.reshape(BB, N, C).astype(jnp.bfloat16)

        y_heads = []
        for h in range(H):
            c0 = h * D
            qh = q3[:, :, c0:c0 + D]                               # (BB, N, D)
            kh = k3[:, :, c0:c0 + D]
            vh = v3[:, :, c0:c0 + D]
            # Integer spike-overlap counts (<= D): exact in f32 and bf16.
            attn = jnp.einsum("bnd,bmd->bnm", qh, kh,
                              preferred_element_type=jnp.float32)
            y_heads.append(
                jnp.einsum("bnm,bmd->bnd", attn.astype(jnp.bfloat16), vh,
                           preferred_element_type=jnp.float32))
        # Concatenate heads along lanes (no scratch buffer / masked D-wide stores);
        # apply SCALE once to the (R, C) result instead of every (N, N) attn tile.
        y_attn = (jnp.concatenate(y_heads, axis=-1) * SCALE).reshape(R, C)

        a_sp = lif(y_attn, a_mem, 0.5)                             # attn_lif (thr 0.5)
        y_proj = jnp.dot(a_sp, wp_ref[...], preferred_element_type=jnp.float32,
                         precision=PREC) + hp_ref[...]             # proj linear + folded BN
        out_ref[0] = lif(y_proj, p_mem, 1.0)                       # proj_lif

    grid = (B // BB, T)

    def const_spec(shape):
        return pl.BlockSpec(shape, lambda b, t: (0, 0))

    in_specs = [
        pl.BlockSpec((1, R, C), lambda b, t: (t, b, 0)),           # x
        const_spec((C, 3 * C)),                                    # fused qkv weights
        const_spec((1, 3 * C)),                                    # fused qkv shift
        const_spec((C, C)),                                        # proj weights
        const_spec((1, C)),                                        # proj shift
    ]
    out_specs = (
        pl.BlockSpec((1, R, C), lambda b, t: (t, b, 0)),           # proj_lif spikes
        pl.BlockSpec((1, R, C), lambda b, t: (t, b, 0)),           # v spikes (lane-dense)
    )
    out_shape = (
        jax.ShapeDtypeStruct((T, B * N, C), jnp.float32),
        jax.ShapeDtypeStruct((T, B * N, C), jnp.float32),
    )
    scratch = [
        pltpu.VMEM((R, 3 * C), jnp.float32),   # fused q/k/v LIF membranes
        pltpu.VMEM((R, C), jnp.float32),       # attn LIF membrane
        pltpu.VMEM((R, C), jnp.float32),       # proj LIF membrane
    ]

    out, vout = pl.pallas_call(
        kernel,
        out_shape=out_shape,
        grid_spec=pltpu.PrefetchScalarGridSpec(
            num_scalar_prefetch=0,
            grid=grid,
            in_specs=in_specs,
            out_specs=out_specs,
            scratch_shapes=scratch),
        compiler_params=pltpu.CompilerParams(
            # batch blocks are independent (megacore-shardable); T is sequential
            # because the LIF membranes are carried across time steps.
            dimension_semantics=("parallel", "arbitrary")),
    )(x_flat, w_qkv, h_qkv, w_p, h_p)

    out = out.reshape(T, B, N, C)
    v = vout.reshape(T, B, N, H, D).transpose(0, 1, 3, 2, 4)       # (T, B, H, N, D)
    return out, v


# ----------------------------------------------------------------------------
# Pure-JAX reference (mirrors the PyTorch forward, BN in eval mode)
# ----------------------------------------------------------------------------
def _lif_scan(x_seq, thresh):
    def step(mem, xt):
        vm = mem + (xt - mem) / TAU
        spike = (vm >= thresh).astype(jnp.float32)
        return vm * (1.0 - spike), spike
    _, spikes = lax.scan(step, jnp.zeros_like(x_seq[0]), x_seq)
    return spikes


def ssa_reference(x, params, num_heads):
    T, B, N, C = x.shape
    H, D = num_heads, C // num_heads
    fp = fold_params(params)   # Linear+BN(eval) as a single folded affine (exact algebra)

    def branch(name):
        y = jnp.einsum("tnc,cd->tnd", x.reshape(T * B, N, C), fp[f"w_{name}"],
                       precision=PREC) + fp[f"h_{name}"]
        return y.reshape(T, B, N, C)

    # NOTE: PyTorch reshapes k/v through (T,B,C,N) before the LIF, but the LIF is
    # elementwise per time step and the tensor is reshaped straight back, so it is
    # a no-op on values.
    q = _lif_scan(branch("q"), 1.0).reshape(T, B, N, H, D).transpose(0, 1, 3, 2, 4)
    k = _lif_scan(branch("k"), 1.0).reshape(T, B, N, H, D).transpose(0, 1, 3, 2, 4)
    v = _lif_scan(branch("v"), 1.0).reshape(T, B, N, H, D).transpose(0, 1, 3, 2, 4)

    attn = jnp.einsum("tbhnd,tbhmd->tbhnm", q, k, precision=PREC) * SCALE
    y = jnp.einsum("tbhnm,tbhmd->tbhnd", attn, v, precision=PREC)
    y = y.transpose(0, 1, 3, 2, 4).reshape(T, B, N, C)
    y = _lif_scan(y, 0.5)
    y = jnp.einsum("tnc,cd->tnd", y.reshape(T * B, N, C), fp["w_proj"],
                   precision=PREC) + fp["h_proj"]
    y = _lif_scan(y.reshape(T, B, N, C), 1.0)
    return y, v


# ----------------------------------------------------------------------------
if __name__ == "__main__":
    T, B, N, C, H = 4, 2, 16, 32, 4
    D = C // H

    key = jax.random.PRNGKey(0)
    kx, kp = jax.random.split(key)
    x = 2.0 * jax.random.normal(kx, (T, B, N, C), jnp.float32)
    params = make_params(kp, C)

    out, vout = ssa_pallas(x, params, H, batch_block=1)
    out, vout = jax.block_until_ready((out, vout))

    ref_out, ref_v = ssa_reference(x, params, H)

    assert out.shape == (T, B, N, C), out.shape
    assert vout.shape == (T, B, H, N, D), vout.shape
    assert jnp.allclose(out, ref_out, atol=1e-5), "output mismatch vs reference"
    assert jnp.allclose(vout, ref_v, atol=1e-5), "v mismatch vs reference"

    print("KERNEL_OK")
</pallas_src>

<mosaic_0001>
module attributes {stable_mosaic.version = 11 : i64} {
  func.func @kernel(%arg0: i32, %arg1: i32, %arg2: memref<1x16x32xf32, #tpu.memory_space<vmem>>, %arg3: memref<32x96xf32, #tpu.memory_space<vmem>>, %arg4: memref<1x96xf32, #tpu.memory_space<vmem>>, %arg5: memref<32x32xf32, #tpu.memory_space<vmem>>, %arg6: memref<1x32xf32, #tpu.memory_space<vmem>>, %arg7: memref<1x16x32xf32, #tpu.memory_space<vmem>>, %arg8: memref<1x16x32xf32, #tpu.memory_space<vmem>>, %arg9: memref<16x96xf32, #tpu.memory_space<vmem>>, %arg10: memref<16x32xf32, #tpu.memory_space<vmem>>, %arg11: memref<16x32xf32, #tpu.memory_space<vmem>>) attributes {dimension_semantics = [#tpu.dimension_semantics<parallel>, #tpu.dimension_semantics<arbitrary>], iteration_bounds = array<i64: 2, 4>, scalar_prefetch = 0 : i64, scratch_operands = 3 : i64, tpu.core_type = #tpu.core_type<tc>, window_params = [{transform_indices = @transform_0, window_bounds = array<i64: 1, 16, 32>}, {pipeline_mode = #tpu.pipeline_mode<synchronous>, transform_indices = @transform_1, window_bounds = array<i64: 32, 96>}, {pipeline_mode = #tpu.pipeline_mode<synchronous>, transform_indices = @transform_2, window_bounds = array<i64: 1, 96>}, {pipeline_mode = #tpu.pipeline_mode<synchronous>, transform_indices = @transform_3, window_bounds = array<i64: 32, 32>}, {pipeline_mode = #tpu.pipeline_mode<synchronous>, transform_indices = @transform_4, window_bounds = array<i64: 1, 32>}, {transform_indices = @transform_5, window_bounds = array<i64: 1, 16, 32>}, {transform_indices = @transform_6, window_bounds = array<i64: 1, 16, 32>}]} {
    %c0_i32 = arith.constant 0 : i32
    %0 = arith.cmpi eq, %arg1, %c0_i32 : i32
    %1 = arith.extui %0 : i1 to i32
    %c0_i32_0 = arith.constant 0 : i32
    %2 = arith.cmpi ne, %1, %c0_i32_0 : i32
    scf.if %2 {
      %cst_54 = arith.constant 0.000000e+00 : f32
      %100 = vector.broadcast %cst_54 : f32 to vector<16x96xf32>
      %c0_55 = arith.constant 0 : index
      %c0_56 = arith.constant 0 : index
      %101 = vector.load %arg9[%c0_55, %c0_56] : memref<16x96xf32, #tpu.memory_space<vmem>>, vector<16x96xf32>
      tpu.vector_store %arg9[%c0_55, %c0_56], %100 {strides = array<i32>} : memref<16x96xf32, #tpu.memory_space<vmem>>, vector<16x96xf32>,
      %cst_57 = arith.constant 0.000000e+00 : f32
      %102 = vector.broadcast %cst_57 : f32 to vector<16x32xf32>
      %c0_58 = arith.constant 0 : index
      %c0_59 = arith.constant 0 : index
      %103 = vector.load %arg10[%c0_58, %c0_59] : memref<16x32xf32, #tpu.memory_space<vmem>>, vector<16x32xf32>
      tpu.vector_store %arg10[%c0_58, %c0_59], %102 {strides = array<i32>} : memref<16x32xf32, #tpu.memory_space<vmem>>, vector<16x32xf32>,
      %cst_60 = arith.constant 0.000000e+00 : f32
      %104 = vector.broadcast %cst_60 : f32 to vector<16x32xf32>
      %c0_61 = arith.constant 0 : index
      %c0_62 = arith.constant 0 : index
      %105 = vector.load %arg11[%c0_61, %c0_62] : memref<16x32xf32, #tpu.memory_space<vmem>>, vector<16x32xf32>
      tpu.vector_store %arg11[%c0_61, %c0_62], %104 {strides = array<i32>} : memref<16x32xf32, #tpu.memory_space<vmem>>, vector<16x32xf32>,
    } else {
    }
    %c0 = arith.constant 0 : index
    %c0_1 = arith.constant 0 : index
    %c0_2 = arith.constant 0 : index
    %3 = vector.load %arg2[%c0, %c0_1, %c0_2] : memref<1x16x32xf32, #tpu.memory_space<vmem>>, vector<1x16x32xf32>
    %4 = vector.shape_cast %3 : vector<1x16x32xf32> to vector<16x32xf32>
    %c0_3 = arith.constant 0 : index
    %c0_4 = arith.constant 0 : index
    %5 = vector.load %arg3[%c0_3, %c0_4] : memref<32x96xf32, #tpu.memory_space<vmem>>, vector<32x96xf32>
    %cst = arith.constant dense<0.000000e+00> : vector<16x96xf32>
    %6 = tpu.matmul %4, %5, %cst {dimension_numbers = #tpu.dot_dimension_numbers<[1], [0], [0], [1], [0, 0, 1, 1], [], []>, precision = #tpu.contract_precision<fp32>} : vector<16x32xf32>, vector<32x96xf32>, vector<16x96xf32> -> vector<16x96xf32>
    %c0_5 = arith.constant 0 : index
    %c0_6 = arith.constant 0 : index
    %7 = vector.load %arg4[%c0_5, %c0_6] : memref<1x96xf32, #tpu.memory_space<vmem>>, vector<1x96xf32>
    %8 = vector.broadcast %7 : vector<1x96xf32> to vector<16x96xf32>
    %9 = arith.addf %6, %8 : vector<16x96xf32>
    %c0_7 = arith.constant 0 : index
    %c0_8 = arith.constant 0 : index
    %10 = vector.load %arg9[%c0_7, %c0_8] : memref<16x96xf32, #tpu.memory_space<vmem>>, vector<16x96xf32>
    %c0_9 = arith.constant 0 : index
    %c0_10 = arith.constant 0 : index
    %11 = vector.load %arg9[%c0_9, %c0_10] : memref<16x96xf32, #tpu.memory_space<vmem>>, vector<16x96xf32>
    %12 = arith.subf %9, %11 : vector<16x96xf32>
    %cst_11 = arith.constant 5.000000e-01 : f32
    %13 = vector.broadcast %cst_11 : f32 to vector<16x96xf32>
    %14 = arith.mulf %12, %13 : vector<16x96xf32>
    %15 = arith.addf %10, %14 : vector<16x96xf32>
    %cst_12 = arith.constant 1.000000e+00 : f32
    %16 = vector.broadcast %cst_12 : f32 to vector<16x96xf32>
    %17 = arith.cmpf oge, %15, %16 : vector<16x96xf32>
    %18 = arith.extui %17 : vector<16x96xi1> to vector<16x96xi32>
    %19 = arith.sitofp %18 : vector<16x96xi32> to vector<16x96xf32>
    %cst_13 = arith.constant 1.000000e+00 : f32
    %20 = vector.broadcast %cst_13 : f32 to vector<16x96xf32>
    %21 = arith.subf %20, %19 : vector<16x96xf32>
    %22 = arith.mulf %15, %21 : vector<16x96xf32>
    %c0_14 = arith.constant 0 : index
    %c0_15 = arith.constant 0 : index
    %23 = vector.load %arg9[%c0_14, %c0_15] : memref<16x96xf32, #tpu.memory_space<vmem>>, vector<16x96xf32>
    tpu.vector_store %arg9[%c0_14, %c0_15], %22 {strides = array<i32>} : memref<16x96xf32, #tpu.memory_space<vmem>>, vector<16x96xf32>,
    %24 = vector.extract_strided_slice %19 {offsets = [0, 64], sizes = [16, 32], strides = [1, 1]} : vector<16x96xf32> to vector<16x32xf32>
    %c0_16 = arith.constant 0 : index
    %c0_17 = arith.constant 0 : index
    %c0_18 = arith.constant 0 : index
    %25 = vector.load %arg8[%c0_16, %c0_17, %c0_18] : memref<1x16x32xf32, #tpu.memory_space<vmem>>, vector<1x16x32xf32>
    %26 = vector.shape_cast %25 : vector<1x16x32xf32> to vector<16x32xf32>
    %27 = vector.shape_cast %24 : vector<16x32xf32> to vector<1x16x32xf32>
    tpu.vector_store %arg8[%c0_16, %c0_17, %c0_18], %27 {strides = array<i32>} : memref<1x16x32xf32, #tpu.memory_space<vmem>>, vector<1x16x32xf32>,
    %28 = vector.extract_strided_slice %19 {offsets = [0, 0], sizes = [16, 32], strides = [1, 1]} : vector<16x96xf32> to vector<16x32xf32>
    %29 = vector.shape_cast %28 : vector<16x32xf32> to vector<1x16x32xf32>
    %30 = arith.truncf %29 : vector<1x16x32xf32> to vector<1x16x32xbf16>
    %31 = vector.extract_strided_slice %19 {offsets = [0, 32], sizes = [16, 32], strides = [1, 1]} : vector<16x96xf32> to vector<16x32xf32>
    %32 = vector.shape_cast %31 : vector<16x32xf32> to vector<1x16x32xf32>
    %33 = arith.truncf %32 : vector<1x16x32xf32> to vector<1x16x32xbf16>
    %34 = vector.shape_cast %24 : vector<16x32xf32> to vector<1x16x32xf32>
    %35 = arith.truncf %34 : vector<1x16x32xf32> to vector<1x16x32xbf16>
    %36 = vector.extract_strided_slice %30 {offsets = [0, 0, 0], sizes = [1, 16, 8], strides = [1, 1, 1]} : vector<1x16x32xbf16> to vector<1x16x8xbf16>
    %37 = vector.extract_strided_slice %33 {offsets = [0, 0, 0], sizes = [1, 16, 8], strides = [1, 1, 1]} : vector<1x16x32xbf16> to vector<1x16x8xbf16>
    %38 = vector.extract_strided_slice %35 {offsets = [0, 0, 0], sizes = [1, 16, 8], strides = [1, 1, 1]} : vector<1x16x32xbf16> to vector<1x16x8xbf16>
    "tpu.trace_start"() <{level = 10 : i32, message = "bnd,bmd->bnm"}> : () -> ()
    %cst_19 = arith.constant dense<0.000000e+00> : vector<1x16x16xf32>
    %39 = tpu.matmul %36, %37, %cst_19 {dimension_numbers = #tpu.dot_dimension_numbers<[2], [2], [1], [1], [0, 0, 0, 1, 1, 1], [0], [0]>} : vector<1x16x8xbf16>, vector<1x16x8xbf16>, vector<1x16x16xf32> -> vector<1x16x16xf32>
    "tpu.trace_stop"() : () -> ()
    %40 = arith.truncf %39 : vector<1x16x16xf32> to vector<1x16x16xbf16>
    "tpu.trace_start"() <{level = 10 : i32, message = "bnm,bmd->bnd"}> : () -> ()
    %cst_20 = arith.constant dense<0.000000e+00> : vector<1x16x8xf32>
    %41 = tpu.matmul %40, %38, %cst_20 {dimension_numbers = #tpu.dot_dimension_numbers<[2], [1], [1], [2], [0, 0, 0, 1, 1, 2], [0], [0]>} : vector<1x16x16xbf16>, vector<1x16x8xbf16>, vector<1x16x8xf32> -> vector<1x16x8xf32>
    "tpu.trace_stop"() : () -> ()
    %42 = vector.extract_strided_slice %30 {offsets = [0, 0, 8], sizes = [1, 16, 8], strides = [1, 1, 1]} : vector<1x16x32xbf16> to vector<1x16x8xbf16>
    %43 = vector.extract_strided_slice %33 {offsets = [0, 0, 8], sizes = [1, 16, 8], strides = [1, 1, 1]} : vector<1x16x32xbf16> to vector<1x16x8xbf16>
    %44 = vector.extract_strided_slice %35 {offsets = [0, 0, 8], sizes = [1, 16, 8], strides = [1, 1, 1]} : vector<1x16x32xbf16> to vector<1x16x8xbf16>
    "tpu.trace_start"() <{level = 10 : i32, message = "bnd,bmd->bnm"}> : () -> ()
    %cst_21 = arith.constant dense<0.000000e+00> : vector<1x16x16xf32>
    %45 = tpu.matmul %42, %43, %cst_21 {dimension_numbers = #tpu.dot_dimension_numbers<[2], [2], [1], [1], [0, 0, 0, 1, 1, 1], [0], [0]>} : vector<1x16x8xbf16>, vector<1x16x8xbf16>, vector<1x16x16xf32> -> vector<1x16x16xf32>
    "tpu.trace_stop"() : () -> ()
    %46 = arith.truncf %45 : vector<1x16x16xf32> to vector<1x16x16xbf16>
    "tpu.trace_start"() <{level = 10 : i32, message = "bnm,bmd->bnd"}> : () -> ()
    %cst_22 = arith.constant dense<0.000000e+00> : vector<1x16x8xf32>
    %47 = tpu.matmul %46, %44, %cst_22 {dimension_numbers = #tpu.dot_dimension_numbers<[2], [1], [1], [2], [0, 0, 0, 1, 1, 2], [0], [0]>} : vector<1x16x16xbf16>, vector<1x16x8xbf16>, vector<1x16x8xf32> -> vector<1x16x8xf32>
    "tpu.trace_stop"() : () -> ()
    %48 = vector.extract_strided_slice %30 {offsets = [0, 0, 16], sizes = [1, 16, 8], strides = [1, 1, 1]} : vector<1x16x32xbf16> to vector<1x16x8xbf16>
    %49 = vector.extract_strided_slice %33 {offsets = [0, 0, 16], sizes = [1, 16, 8], strides = [1, 1, 1]} : vector<1x16x32xbf16> to vector<1x16x8xbf16>
    %50 = vector.extract_strided_slice %35 {offsets = [0, 0, 16], sizes = [1, 16, 8], strides = [1, 1, 1]} : vector<1x16x32xbf16> to vector<1x16x8xbf16>
    "tpu.trace_start"() <{level = 10 : i32, message = "bnd,bmd->bnm"}> : () -> ()
    %cst_23 = arith.constant dense<0.000000e+00> : vector<1x16x16xf32>
    %51 = tpu.matmul %48, %49, %cst_23 {dimension_numbers = #tpu.dot_dimension_numbers<[2], [2], [1], [1], [0, 0, 0, 1, 1, 1], [0], [0]>} : vector<1x16x8xbf16>, vector<1x16x8xbf16>, vector<1x16x16xf32> -> vector<1x16x16xf32>
    "tpu.trace_stop"() : () -> ()
    %52 = arith.truncf %51 : vector<1x16x16xf32> to vector<1x16x16xbf16>
    "tpu.trace_start"() <{level = 10 : i32, message = "bnm,bmd->bnd"}> : () -> ()
    %cst_24 = arith.constant dense<0.000000e+00> : vector<1x16x8xf32>
    %53 = tpu.matmul %52, %50, %cst_24 {dimension_numbers = #tpu.dot_dimension_numbers<[2], [1], [1], [2], [0, 0, 0, 1, 1, 2], [0], [0]>} : vector<1x16x16xbf16>, vector<1x16x8xbf16>, vector<1x16x8xf32> -> vector<1x16x8xf32>
    "tpu.trace_stop"() : () -> ()
    %54 = vector.extract_strided_slice %30 {offsets = [0, 0, 24], sizes = [1, 16, 8], strides = [1, 1, 1]} : vector<1x16x32xbf16> to vector<1x16x8xbf16>
    %55 = vector.extract_strided_slice %33 {offsets = [0, 0, 24], sizes = [1, 16, 8], strides = [1, 1, 1]} : vector<1x16x32xbf16> to vector<1x16x8xbf16>
    %56 = vector.extract_strided_slice %35 {offsets = [0, 0, 24], sizes = [1, 16, 8], strides = [1, 1, 1]} : vector<1x16x32xbf16> to vector<1x16x8xbf16>
    "tpu.trace_start"() <{level = 10 : i32, message = "bnd,bmd->bnm"}> : () -> ()
    %cst_25 = arith.constant dense<0.000000e+00> : vector<1x16x16xf32>
    %57 = tpu.matmul %54, %55, %cst_25 {dimension_numbers = #tpu.dot_dimension_numbers<[2], [2], [1], [1], [0, 0, 0, 1, 1, 1], [0], [0]>} : vector<1x16x8xbf16>, vector<1x16x8xbf16>, vector<1x16x16xf32> -> vector<1x16x16xf32>
    "tpu.trace_stop"() : () -> ()
    %58 = arith.truncf %57 : vector<1x16x16xf32> to vector<1x16x16xbf16>
    "tpu.trace_start"() <{level = 10 : i32, message = "bnm,bmd->bnd"}> : () -> ()
    %cst_26 = arith.constant dense<0.000000e+00> : vector<1x16x8xf32>
    %59 = tpu.matmul %58, %56, %cst_26 {dimension_numbers = #tpu.dot_dimension_numbers<[2], [1], [1], [2], [0, 0, 0, 1, 1, 2], [0], [0]>} : vector<1x16x16xbf16>, vector<1x16x8xbf16>, vector<1x16x8xf32> -> vector<1x16x8xf32>
    "tpu.trace_stop"() : () -> ()
    %60 = tpu.concatenate %41, %47, %53, %59 in 2 : vector<1x16x8xf32>, vector<1x16x8xf32>, vector<1x16x8xf32>, vector<1x16x8xf32> -> vector<1x16x32xf32>
    %cst_27 = arith.constant 1.250000e-01 : f32
    %61 = vector.broadcast %cst_27 : f32 to vector<1x16x32xf32>
    %62 = arith.mulf %60, %61 : vector<1x16x32xf32>
    %63 = vector.shape_cast %62 : vector<1x16x32xf32> to vector<16x32xf32>
    %c0_28 = arith.constant 0 : index
    %c0_29 = arith.constant 0 : index
    %64 = vector.load %arg10[%c0_28, %c0_29] : memref<16x32xf32, #tpu.memory_space<vmem>>, vector<16x32xf32>
    %c0_30 = arith.constant 0 : index
    %c0_31 = arith.constant 0 : index
    %65 = vector.load %arg10[%c0_30, %c0_31] : memref<16x32xf32, #tpu.memory_space<vmem>>, vector<16x32xf32>
    %66 = arith.subf %63, %65 : vector<16x32xf32>
    %cst_32 = arith.constant 5.000000e-01 : f32
    %67 = vector.broadcast %cst_32 : f32 to vector<16x32xf32>
    %68 = arith.mulf %66, %67 : vector<16x32xf32>
    %69 = arith.addf %64, %68 : vector<16x32xf32>
    %cst_33 = arith.constant 5.000000e-01 : f32
    %70 = vector.broadcast %cst_33 : f32 to vector<16x32xf32>
    %71 = arith.cmpf oge, %69, %70 : vector<16x32xf32>
    %72 = arith.extui %71 : vector<16x32xi1> to vector<16x32xi32>
    %73 = arith.sitofp %72 : vector<16x32xi32> to vector<16x32xf32>
    %cst_34 = arith.constant 1.000000e+00 : f32
    %74 = vector.broadcast %cst_34 : f32 to vector<16x32xf32>
    %75 = arith.subf %74, %73 : vector<16x32xf32>
    %76 = arith.mulf %69, %75 : vector<16x32xf32>
    %c0_35 = arith.constant 0 : index
    %c0_36 = arith.constant 0 : index
    %77 = vector.load %arg10[%c0_35, %c0_36] : memref<16x32xf32, #tpu.memory_space<vmem>>, vector<16x32xf32>
    tpu.vector_store %arg10[%c0_35, %c0_36], %76 {strides = array<i32>} : memref<16x32xf32, #tpu.memory_space<vmem>>, vector<16x32xf32>,
    %c0_37 = arith.constant 0 : index
    %c0_38 = arith.constant 0 : index
    %78 = vector.load %arg5[%c0_37, %c0_38] : memref<32x32xf32, #tpu.memory_space<vmem>>, vector<32x32xf32>
    %cst_39 = arith.constant dense<0.000000e+00> : vector<16x32xf32>
    %79 = tpu.matmul %73, %78, %cst_39 {dimension_numbers = #tpu.dot_dimension_numbers<[1], [0], [0], [1], [0, 0, 1, 1], [], []>, precision = #tpu.contract_precision<fp32>} : vector<16x32xf32>, vector<32x32xf32>, vector<16x32xf32> -> vector<16x32xf32>
    %c0_40 = arith.constant 0 : index
    %c0_41 = arith.constant 0 : index
    %80 = vector.load %arg6[%c0_40, %c0_41] : memref<1x32xf32, #tpu.memory_space<vmem>>, vector<1x32xf32>
    %81 = vector.broadcast %80 : vector<1x32xf32> to vector<16x32xf32>
    %82 = arith.addf %79, %81 : vector<16x32xf32>
    %c0_42 = arith.constant 0 : index
    %c0_43 = arith.constant 0 : index
    %83 = vector.load %arg11[%c0_42, %c0_43] : memref<16x32xf32, #tpu.memory_space<vmem>>, vector<16x32xf32>
    %c0_44 = arith.constant 0 : index
    %c0_45 = arith.constant 0 : index
    %84 = vector.load %arg11[%c0_44, %c0_45] : memref<16x32xf32, #tpu.memory_space<vmem>>, vector<16x32xf32>
    %85 = arith.subf %82, %84 : vector<16x32xf32>
    %cst_46 = arith.constant 5.000000e-01 : f32
    %86 = vector.broadcast %cst_46 : f32 to vector<16x32xf32>
    %87 = arith.mulf %85, %86 : vector<16x32xf32>
    %88 = arith.addf %83, %87 : vector<16x32xf32>
    %cst_47 = arith.constant 1.000000e+00 : f32
    %89 = vector.broadcast %cst_47 : f32 to vector<16x32xf32>
    %90 = arith.cmpf oge, %88, %89 : vector<16x32xf32>
    %91 = arith.extui %90 : vector<16x32xi1> to vector<16x32xi32>
    %92 = arith.sitofp %91 : vector<16x32xi32> to vector<16x32xf32>
    %cst_48 = arith.constant 1.000000e+00 : f32
    %93 = vector.broadcast %cst_48 : f32 to vector<16x32xf32>
    %94 = arith.subf %93, %92 : vector<16x32xf32>
    %95 = arith.mulf %88, %94 : vector<16x32xf32>
    %c0_49 = arith.constant 0 : index
    %c0_50 = arith.constant 0 : index
    %96 = vector.load %arg11[%c0_49, %c0_50] : memref<16x32xf32, #tpu.memory_space<vmem>>, vector<16x32xf32>
    tpu.vector_store %arg11[%c0_49, %c0_50], %95 {strides = array<i32>} : memref<16x32xf32, #tpu.memory_space<vmem>>, vector<16x32xf32>,
    %c0_51 = arith.constant 0 : index
    %c0_52 = arith.constant 0 : index
    %c0_53 = arith.constant 0 : index
    %97 = vector.load %arg7[%c0_51, %c0_52, %c0_53] : memref<1x16x32xf32, #tpu.memory_space<vmem>>, vector<1x16x32xf32>
    %98 = vector.shape_cast %97 : vector<1x16x32xf32> to vector<16x32xf32>
    %99 = vector.shape_cast %92 : vector<16x32xf32> to vector<1x16x32xf32>
    tpu.vector_store %arg7[%c0_51, %c0_52, %c0_53], %99 {strides = array<i32>} : memref<1x16x32xf32, #tpu.memory_space<vmem>>, vector<1x16x32xf32>,
    return
  }
  func.func @transform_0(%arg0: i32, %arg1: i32) -> (i32, i32, i32) {
    %c0_i32 = arith.constant 0 : i32
    %c0_i32_0 = arith.constant 0 : i32
    return %arg1, %arg0, %c0_i32 : i32, i32, i32
  }
  func.func @transform_1(%arg0: i32, %arg1: i32) -> (i32, i32) {
    %c0_i32 = arith.constant 0 : i32
    %c0_i32_0 = arith.constant 0 : i32
    %c0_i32_1 = arith.constant 0 : i32
    return %c0_i32, %c0_i32_0 : i32, i32
  }
  func.func @transform_2(%arg0: i32, %arg1: i32) -> (i32, i32) {
    %c0_i32 = arith.constant 0 : i32
    %c0_i32_0 = arith.constant 0 : i32
    %c0_i32_1 = arith.constant 0 : i32
    return %c0_i32, %c0_i32_0 : i32, i32
  }
  func.func @transform_3(%arg0: i32, %arg1: i32) -> (i32, i32) {
    %c0_i32 = arith.constant 0 : i32
    %c0_i32_0 = arith.constant 0 : i32
    %c0_i32_1 = arith.constant 0 : i32
    return %c0_i32, %c0_i32_0 : i32, i32
  }
  func.func @transform_4(%arg0: i32, %arg1: i32) -> (i32, i32) {
    %c0_i32 = arith.constant 0 : i32
    %c0_i32_0 = arith.constant 0 : i32
    %c0_i32_1 = arith.constant 0 : i32
    return %c0_i32, %c0_i32_0 : i32, i32
  }
  func.func @transform_5(%arg0: i32, %arg1: i32) -> (i32, i32, i32) {
    %c0_i32 = arith.constant 0 : i32
    %c0_i32_0 = arith.constant 0 : i32
    return %arg1, %arg0, %c0_i32 : i32, i32, i32
  }
  func.func @transform_6(%arg0: i32, %arg1: i32) -> (i32, i32, i32) {
    %c0_i32 = arith.constant 0 : i32
    %c0_i32_0 = arith.constant 0 : i32
    return %arg1, %arg0, %c0_i32 : i32, i32, i32
  }
}

</mosaic_0001>

<bundles_post_ra>
// kernel: tpu_custom_call.1
= control target key start
LH: loop header
LB: loop body
LE: loop exit
PB: predicated region body
PF: predicated region fallthrough
CT: control target
= control target key end

     0   :  { %s3452_s0 = inlined_call_operand.hbm [shape: f32[4,32,32], index: 0, kind: input, shape index: {}]   ;;  %s3453_s1 = inlined_call_operand.hbm [shape: f32[32,96], index: 1, kind: input, shape index: {}]   ;;  %s3454_s2 = inlined_call_operand.vmem [shape: f32[1,96], index: 2, kind: input, shape index: {}]   ;;  %s3455_s3 = inlined_call_operand.hbm [shape: f32[32,32], index: 3, kind: input, shape index: {}]   ;;  %s3456_s4 = inlined_call_operand.vmem [shape: f32[1,32], index: 4, kind: input, shape index: {}]   ;;  %s3457_s5 = inlined_call_operand.hbm [shape: f32[4,32,32], index: 5, kind: output, shape index: {0}]   ;;  %s3458_s6 = inlined_call_operand.hbm [shape: f32[4,32,32], index: 6, kind: output, shape index: {1}]  }
   0x1   :  { %3470 = sst [smem:[#allocation21_spill]] %s3453_s1 }
   0x2   :  { %3471 = sst [smem:[#allocation22_spill]] %s3455_s3 }
   0x3   :  { %3472 = sst [smem:[#allocation23_spill]] %s3456_s4 }
   0x4   :  { %3473 = sst [smem:[#allocation24_spill]] %s3457_s5 }
   0x5   :  { %3474 = sst [smem:[#allocation25_spill]] %s3458_s6 }
   0x6   :  { %12 = vsyncpa [#allocation6], 0 }
   0x7   :  { %14 = vsyncpa [#allocation6 + $0x1], 0 }
   0x8   :  { %15 = vsyncpa [#allocation9], 0 }
   0x9   :  { %16 = vsyncpa [#allocation7], 0 }
   0xa   :  { %18 = vsyncpa [#allocation7 + $0x1], 0 }
   0xb   :  { %19 = vsyncpa [#allocation13], 0 }
   0xc   :  { %21 = vsyncpa [#allocation13 + $0x1], 0  ;;  %s2974_s21 = smov 0   ;;  %s2976_s22 = smov 0  }
   0xd   :  { %s2978_s23 = smov 0   ;;  %s2980_s24 = smov 0  }
   0xe   :  { %s2982_s25 = smov 0   ;;  %s2984_s26 = smov 0  }
   0xf   :  { %s2986_s27 = smov 0   ;;  %s2988_s28 = smov 0  }
  0x10 LB: > { %3475 = sst [smem:[#allocation18_spill]] %s2884_s21  ;;  %s2126_s29 = sadd.s32 4294967295, %s2912_s28   ;;  %s2912_s28 = sphi %s2988_s28, %s27_s28   ;;  %s2908_s27 = sphi %s2986_s27, %s3508_s27   ;;  %s2904_s26 = sphi %s2984_s26, %s3507_s26   ;;  %s2900_s25 = sphi %s2982_s25, %s3506_s25   ;;  %s2896_s24 = sphi %s2980_s24, %s3505_s24   ;;  %s2892_s23 = sphi %s2978_s23, %s3504_s23   ;;  %s2888_s22 = sphi %s2976_s22, %s3503_s22   ;;  %s2884_s21 = sphi %s2974_s21, %s3502_s21  }
  0x11   : > { %s2127_s30 = sadd.s32 4294967294, %s2912_s28   ;;  %p61_p0 = scmp.ne.s32.totalorder %s2888_s22, %s2884_s21 }
  0x12   : > { %p3018_p1 = scmp.eq.s32.totalorder %s2126_s29, 0  ;;  %p3022_p2 = scmp.eq.s32.totalorder %s2126_s29, 7 }
  0x13   : > { %p177_p3 = scmp.eq.s32.totalorder %s2127_s30, 7  ;;  %p2128_p5 = scmp.ge.s32.totalorder %s2912_s28, 1 }
  0x14   : > { %s3476_s7 = scalar_select %p3018_p1, 1, 0 }
  0x15   : > { %s3477_s8 = scalar_select %p3022_p2, 1, 0 }
  0x16   : > { %p3028_p4 = por %p3018_p1, %p61_p0  ;;  %p3033_p6 = por %p177_p3, %p61_p0 }
  0x17   : > { %p212_p7 = scmp.lt.s32.totalorder %s2912_s28, 9  ;;  %s2914_s12 = smov [#allocation8]  }
  0x18   : > { %s3478_s9 = scalar_select %p3028_p4, 1, 0 }
  0x19   : > { %s3479_s10 = scalar_select %p3033_p6, 1, 0 }
  0x1a   : > { %p3038_p8 = pnand %p2128_p5, %p212_p7  ;;  %s224_s13 = sshll.u32 %s2914_s12, 4  ;;  %s225_s13 = int_to_ptr.vmem [resolvable:$true] %s224_s13 }
  0x1b   : > { %3480 = sst [smem:[#allocation19_spill]] %s3479_s10  ;;  %s2915_s15 = smov [#allocation10]  }
  0x1c   : > { %s3481_s11 = scalar_select %p3038_p8, 1, 0 }
  0x1d   : > { %p2577_p9 = pneg %p3038_p8  ;;  %s240_s16 = sshll.u32 %s2915_s15, 4  ;;  %s3050_s16 = int_to_ptr.vmem [resolvable:$true] %s240_s16 }
  0x1e   : > { %s3483_s1 = sld [smem:[#allocation21_spill]] }
  0x1f   : > { %p3046_p10 = pnand %p2577_p9, %p3018_p1 }
  0x21   : > { %p2694_p12 = pneg %p3046_p10 }
  0x24   : > { %s2692_s19 = scalar_lea.hbm %s3483_s1, 512 }
  0x25   : > { %p2693_p11 = scmp.ne.s32.totalorder %s3483_s1, %s2692_s19  ;;  %p2699_p3 = scmp.lt.u32.totalorder %s2692_s19, %s3483_s1 }
  0x27   : > { %p2695_p13 = pnand %p2694_p12, %p2693_p11 }
  0x29   : > { %p2696_p0 = pneg %p2695_p13 }
  0x2b   : > { %p2701_p5 = pnand %p2699_p3, %p2696_p0 }
  0x2d   : > { %2704 = shalt.err (!%p2701_p5)
}
  0x2e   : > { %s2705_s15 = scalar_lea.vmem %s225_s13, 512  ;;  %p2713_p1 = scmp.lt.s32.totalorder %s225_s13, %s225_s13 }
  0x2f   : > { %p2706_p7 = scmp.ne.s32.totalorder %s225_s13, %s2705_s15  ;;  %p2714_p4 = scmp.lt.s32.totalorder %s2705_s15, %s2705_s15 }
  0x31   : > { %p2708_p9 = pnand %p2706_p7, %p2694_p12  ;;  %p2715_p8 = por %p2714_p4, %p2713_p1 }
  0x33   : > { %p2709_p6 = pneg %p2708_p9 }
  0x35   : > { %p2716_p2 = pnand %p2715_p8, %p2709_p6 }
  0x37   : > { %2719 = shalt.err (!%p2716_p2)
}
  0x38   : > { %s3466_s17 = smov 128   ;;  %s3467_s18 = smov 8  }
  0x39   : > { %2580 = dma.hbm_to_vmem [thread:$0]  (!%p3046_p10), %s3483_s1, 512, %s225_s13, [#allocation9], %s3466_s17, %s3466_s17, %s3467_s18  }
  0x3a   : > { %s3484_s3 = sld [smem:[#allocation22_spill]] }
  0x40   : > { %s2720_s12 = scalar_lea.hbm %s3484_s3, 512 }
  0x41   : > { %p2721_p1 = scmp.ne.s32.totalorder %s3484_s3, %s2720_s12  ;;  %p2727_p6 = scmp.lt.u32.totalorder %s2720_s12, %s3484_s3 }
  0x43   : > { %p2723_p2 = pnand %p2721_p1, %p2694_p12 }
  0x45   : > { %p2724_p4 = pneg %p2723_p2 }
  0x47   : > { %p2729_p8 = pnand %p2727_p6, %p2724_p4 }
  0x49   : > { %2732 = shalt.err (!%p2729_p8)
}
  0x4a   : > { %s2733_s13 = scalar_lea.vmem %s3050_s16, 512  ;;  %p2741_p3 = scmp.lt.s32.totalorder %s3050_s16, %s3050_s16 }
  0x4b   : > { %p2734_p11 = scmp.ne.s32.totalorder %s3050_s16, %s2733_s13  ;;  %p2742_p5 = scmp.lt.s32.totalorder %s2733_s13, %s2733_s13 }
  0x4d   : > { %p2736_p13 = pnand %p2734_p11, %p2694_p12  ;;  %p2743_p7 = por %p2742_p5, %p2741_p3 }
  0x4f   : > { %p2737_p0 = pneg %p2736_p13 }
  0x51   : > { %p2744_p9 = pnand %p2743_p7, %p2737_p0 }
  0x53   : > { %2747 = shalt.err (!%p2744_p9)
}
  0x54   : > { %2583 = dma.hbm_to_vmem [thread:$0]  (!%p3046_p10), %s3484_s3, 512, %s3050_s16, [#allocation9], %s3466_s17, %s3466_s17, %s3467_s18  }
  0x55   : > { %s36_s10 = sadd.s32 1, %s2904_s26  ;;  %s39_s14 = sadd.s32 1, %s2908_s27 }
  0x56   : > { %p37_p12 = scmp.ge.s32.totalorder %s36_s10, 4  ;;  %s48_s19 = sadd.s32 1, %s2892_s23 }
  0x57   : > { %p55_p1 = scmp.ne.s32.totalorder %s2892_s23, %s2888_s22  ;;  %p56_p2 = scmp.eq.s32.totalorder %s2912_s28, 0 }
  0x58   : > { %s3510_s10 = smov (%p37_p12, %s36_s10), 0  ;;  %s3512_s14 = smov (!%p37_p12, %s39_s14), %s2908_s27 }
  0x59   : > { %3485 = sst [smem:[#allocation20_spill]] %s3510_s10  ;;  %s43_s20 = ssub.s32 %s2904_s26, %s3510_s10 }
  0x5a   : > { %p3116_p4 = por %p56_p2, %p55_p1  ;;  %p41_p10 = scmp.ge.s32.totalorder %s3512_s14, 2 }
  0x5b   : > { %p3487_p6 = scmp.ne.s32.totalorder %s3477_s8, 0  ;;  %p2597_p11 = scmp.lt.s32.totalorder %s2912_s28, 8 }
  0x5c   : > { %s257_s30 = sand.u32 1, %s2892_s23   ;;  %s3514_s14 = smov (%p41_p10, %s3512_s14), 0 }
  0x5d   : > { %p3122_p8 = por %p3487_p6, %p55_p1  ;;  %s2132_s12 = sshll.u32 %s257_s30, 4 }
  0x5e   : > { %s44_s15 = ssub.s32 %s2908_s27, %s3514_s14  ;;  %s2133_s5 = sshll.u32 %s2908_s27, 1 }
  0x5f   : > { %s45_s13 = sor.u32 %s44_s15, %s43_s20  ;;  %s2134_s21 = sshll.u32 %s2904_s26, 2 }
  0x60   : > { %p46_p13 = scmp.eq.s32.totalorder %s45_s13, 0  ;;  %s267_s17 = sadd.s32 %s2134_s21, %s2133_s5 }
  0x61   : > { %s261_s18 = scalar_lea.vmem [#allocation5], %s2132_s12  ;;  %s2135_s3 = sshll.u32 %s267_s17, 7 }
  0x62   : > { %s270_s8 = sshll.u32 %s261_s18, 4  ;;  %s3142_s6 = scalar_lea.hbm %s3452_s0, %s2135_s3  ;;  %s3137_s8 = int_to_ptr.vmem [resolvable:$true] %s270_s8 }
  0x63   : > { %s3135_s1 = scalar_select %p46_p13, %s2892_s23, %s48_s19  }
  0x64   : > { %p3148_p0 = pnand %p2597_p11, %p3116_p4  ;;  %s3152_s17 = scalar_lea.sflag [#allocation6], %s257_s30 }
  0x65   : > { %s2748_s18 = scalar_lea.hbm %s3142_s6, 256  ;;  %s2753_s10 = scalar_lea.hbm %s3452_s0, 2048 }
  0x66   : > { %p2749_p3 = scmp.ne.s32.totalorder %s3142_s6, %s2748_s18  ;;  %p2750_p5 = pneg %p3148_p0 }
  0x67   : > { %p2754_p12 = scmp.lt.u32.totalorder %s3142_s6, %s3452_s0  ;;  %p2755_p1 = scmp.lt.u32.totalorder %s2753_s10, %s2748_s18 }
  0x68   : > { %p2751_p7 = pnand %p2750_p5, %p2749_p3  ;;  %p2757_p4 = scmp.lt.u32.totalorder %s2748_s18, %s3142_s6 }
  0x69   : > { %p2756_p2 = por %p2755_p1, %p2754_p12 }
  0x6a   : > { %p2752_p9 = pneg %p2751_p7 }
  0x6b   : > { %p2758_p10 = por %p2757_p4, %p2756_p2 }
  0x6d   : > { %p2759_p6 = pnand %p2758_p10, %p2752_p9 }
  0x6f   : > { %2762 = shalt.err (!%p2759_p6)
}
  0x70   : > { %s2763_s30 = scalar_lea.vmem %s3137_s8, 256  ;;  %s2918_s12 = smov [#allocation5]  }
  0x71   : > { %p2764_p11 = scmp.ne.s32.totalorder %s3137_s8, %s2763_s30  ;;  %s2768_s15 = sshll.u32 %s2918_s12, 4  ;;  %s2769_s15 = int_to_ptr.vmem [resolvable:$false] %s2768_s15 }
  0x72   : > { %s2770_s13 = scalar_lea.vmem %s2769_s15, 512  ;;  %p2771_p7 = scmp.lt.s32.totalorder %s3137_s8, %s2769_s15 }
  0x73   : > { %p2766_p13 = pnand %p2764_p11, %p2750_p5  ;;  %p2772_p12 = scmp.lt.s32.totalorder %s2770_s13, %s2763_s30 }
  0x75   : > { %p2767_p3 = pneg %p2766_p13  ;;  %p2773_p1 = por %p2772_p12, %p2771_p7 }
  0x77   : > { %p2774_p2 = pnand %p2773_p1, %p2767_p3 }
  0x79   : > { %2777 = shalt.err (!%p2774_p2)
}
  0x7a   : > { %s3490_s5 = smov 8   ;;  %s3491_s21 = smov 128  }
  0x7b   : > { %2587 = dma.hbm_to_vmem [thread:$0]  (!%p3148_p0), %s3142_s6, 256, %s3137_s8, %s3152_s17, %s3491_s21, %s3491_s21, %s3490_s5  }
  0x7c   : > { %p3492_p5 = scmp.ne.s32.totalorder %s3481_s11, 0 }
  0x7d   : > { %s3186_s18 = sand.u32 (!%p3492_p5), 1, %s2888_s22   ;;  %p3493_p9 = scmp.ne.s32.totalorder (!%p3492_p5), %s3478_s9, 0 }
  0x7e   : > { %282 = sbr.rel (%p3492_p5) target bundleno = 1818 (0x71a), region = 40  ;;  %s3189_s3 = sshll.u32 (!%p3492_p5), %s3186_s18, 4 }
  0x7f   : > { %s285_s20 = scalar_lea.sflag (!%p3492_p5), [#allocation6], %s3186_s18  ;;  %s288_s4 = scalar_lea.vmem (!%p3492_p5), [#allocation5], %s3189_s3 }
  0x85   : > { %2867 = dma.done.wait (%p3493_p9), %s285_s20, 256  }
  0x86   : > { %2869 = vsyncadd (%p3493_p9), %s285_s20, 4294967040  ;;  %p3494_p0 = scmp.ne.s32.totalorder %s3476_s7, 0 }
  0x88   : > { %2871 = dma.done.wait (%p3494_p0), [#allocation9], 1024  }
  0x89   : > { %2873 = vsyncadd (%p3494_p0), [#allocation9], 4294966272  ;;  %s3202_s6 = scalar_lea.vmem [#allocation11], %s3189_s3  ;;  %s3205_s11 = scalar_lea.vmem [#allocation12], %s3189_s3 }
  0x8a   : > { %p2142_p4 = scmp.ne.s32.totalorder %s2896_s24, 0 }
  0x8b   : > { %vm338_vm0 = vcmask (!%p2142_p4), 785408   ;;  %vm341_vm1 = vcmask (!%p2142_p4), 261120   ;;  %v2919_v0 = vmov (!%p2142_p4), 0.0  }
  0x8c   : > { %337 = sbr.rel (%p2142_p4) target bundleno = 147 (0x93), region = 56  ;;  %339 = vst.msk [vmem:[#allocation2] sm:$0xff] (!%p2142_p4), %vm338_vm0, %v2919_v0  ;;  %340 = vst.msk [vmem:[#allocation2 + $0x8] sm:$0xff] (!%p2142_p4), %vm338_vm0, %v2919_v0 }
  0x8d   : > { %342 = vst.msk [vmem:[#allocation3] sm:$0xff] (!%p2142_p4), %vm341_vm1, %v2919_v0  ;;  %343 = vst.msk [vmem:[#allocation3 + $0x8] sm:$0xff] (!%p2142_p4), %vm341_vm1, %v2919_v0 }
  0x8e   : > { %344 = vst.msk [vmem:[#allocation4] sm:$0xff] (!%p2142_p4), %vm341_vm1, %v2919_v0  ;;  %345 = vst.msk [vmem:[#allocation4 + $0x8] sm:$0xff] (!%p2142_p4), %vm341_vm1, %v2919_v0 }
  0x93 PF: > { %v348_v1 = vld [vmem:[#allocation8] sm:$0xff]  ;;  %v349_v2 = vld [vmem:[#allocation8 + $0x8] sm:$0xff]  ;;  %v350_v3 = vld [vmem:[#allocation8 + $0x10] sm:$0xff]  ;;  %vm359_vm2 = vcmask 261120   ;;  %v2920_v47 = vmov 0.0   ;;  %vm2921_vm3 = vmmov 0  }
  0x94   : > { %v367_v4 = vand.u32 4294901760, %v348_v1  ;;  %v370_v5 = vand.u32 4294901760, %v349_v2  ;;  %v351_v6 = vld [vmem:[#allocation8 + $0x18] sm:$0xff]  ;;  %v373_v7 = vand.u32 4294901760, %v350_v3  ;;  %v346_v8 = vld [vmem:[%s288_s4] sm:$0xff]  ;;  %vm912_vm6 = vcmask 785408  }
  0x95   : > { %v347_v9 = vld [vmem:[%s288_s4 + $0x8] sm:$0xff]  ;;  %v376_v10 = vand.u32 4294901760, %v351_v6  ;;  %v361_v11 = vsel %vm359_vm2, %v346_v8, 0  ;;  %v2143_v50 = vld [vmem:[%s3454_s2] ss:$0 sm:$0xff]  ;;  %s2922_s8 = smov 88  }
  0x96   : > { %v364_v12 = vsel %vm359_vm2, %v347_v9, 0  ;;  %v3210_v13 = vpack.c.bf16 %v370_v5, %v367_v4  ;;  %v457_v14 = vsub.f32 %v348_v1, %v367_v4  ;;  %v464_v15 = vsub.f32 %v349_v2, %v370_v5  ;;  %v895_v54 = vld [vmem:[#allocation2 + $0x8] sm:$0xff]  ;;  %v894_v57 = vld [vmem:[#allocation2] sm:$0xff]  ;;  %s2923_s17 = smov 96   ;;  %s2924_s10 = smov 120  }
  0x97   : > { %v471_v16 = vsub.f32 %v350_v3, %v373_v7  ;;  %v3212_v17 = vpack.c.bf16 %v376_v10, %v373_v7  ;;  %v478_v18 = vsub.f32 %v351_v6, %v376_v10  ;;  %v435_v19 = vand.u32 4294901760, %v361_v11  ;;  %s2925_s19 = smov 64   ;;  %s2926_s29 = smov 80  }
  0x98   : > { %v445_v20 = vand.u32 4294901760, %v364_v12  ;;  %v2459_v21 = vpack.c.bf16 %v464_v15, %v457_v14  ;;  %2444 = vmatprep.subr.bf16.mxu1 %v3210_v13  ;;  %v458_v22 = vand.u32 4294901760, %v457_v14  ;;  %v465_v23 = vand.u32 4294901760, %v464_v15  ;;  %s2927_s30 = smov 56   ;;  %s2928_s12 = smov 72  }
  0x99   : > { %v472_v24 = vand.u32 4294901760, %v471_v16  ;;  %v2463_v25 = vpack.c.bf16 %v478_v18, %v471_v16  ;;  %2446 = vmatpush3.bf16.msra.mxu1 %v3210_v13  ;;  %v436_v26 = vsub.f32 %v361_v11, %v435_v19  ;;  %v479_v28 = vand.u32 4294901760, %v478_v18  ;;  %s2929_s15 = smov 112   ;;  %s2930_s13 = smov 48  }
  0x9a   : > { %v446_v27 = vsub.f32 %v364_v12, %v445_v20  ;;  %2460 = vmatprep.subr.bf16.mxu0 %v2459_v21  ;;  %2448 = vmatprep.subr.bf16.mxu1 %v3212_v17  ;;  %v459_v29 = vsub.f32 %v457_v14, %v458_v22  ;;  %v466_v30 = vsub.f32 %v464_v15, %v465_v23  ;;  %s2931_s5 = smov 104   ;;  %s2932_s21 = smov 40   ;;  %vm929_vm7 = vcmask 64512  }
  0x9b   : > { %2462 = vmatpush3.bf16.msra.mxu0 %v2459_v21  ;;  %2293 = vmatprep.mubr.f32.mxu0 %v436_v26  ;;  %v437_v31 = vand.u32 4294901760, %v436_v26  ;;  %v473_v33 = vsub.f32 %v471_v16, %v472_v24  ;;  %v480_v34 = vsub.f32 %v478_v18, %v479_v28  ;;  %v2475_v45 = vpack.c.bf16 %v465_v23, %v458_v22  ;;  %s2933_s3 = smov 8   ;;  %s2934_s20 = smov 16  }
  0x9c   : > { %v447_v32 = vand.u32 4294901760, %v446_v27  ;;  %2464 = vmatprep.subr.bf16.mxu0 %v2463_v25  ;;  %v460_v35 = vand.u32 4294901760, %v459_v29  ;;  %v467_v36 = vand.u32 4294901760, %v466_v30  ;;  %v2479_v46 = vpack.c.bf16 %v479_v28, %v472_v24  ;;  %s2935_s4 = smov 24   ;;  %s2167_s7 = sshll.u32 %s2900_s25, 1 }
  0x9d   : > { %2450 = vmatpush3.bf16.msra.mxu1 %v3212_v17  ;;  %v438_v37 = vsub.f32 %v436_v26, %v437_v31  ;;  %v474_v39 = vand.u32 4294901760, %v473_v33  ;;  %v481_v40 = vand.u32 4294901760, %v480_v34  ;;  %vm981_vm8 = vcmask 130048   ;;  %s2168_s9 = sshll.u32 %s2896_s24, 2  ;;  %s2936_s24 = smov [#allocation12]  }
  0x9e   : > { %v448_v38 = vsub.f32 %v446_v27, %v447_v32  ;;  %v2451_v41 = vpack.c.bf16 %v467_v36, %v460_v35  ;;  %vm1351_vm9 = vcmask 195584  }
  0x9f   : > { %2466 = vmatpush3.bf16.msra.mxu0 %v2463_v25  ;;  %v439_v42 = vand.u32 4294901760, %v438_v37  ;;  %v2455_v44 = vpack.c.bf16 %v481_v40, %v474_v39 }
  0xa0   : > { %v449_v43 = vand.u32 4294901760, %v448_v38  ;;  %2468 = vmatprep.subr.bf16.mxu0 %v3210_v13  ;;  %2452 = vmatprep.subr.bf16.mxu1 %v2451_v41 }
  0xa1   : > { %2271 = vmatprep.mubr.f32.mxu1 %v439_v42 }
  0xa2   : > { %2294 = vmatmul.mubr.f32.vlgmr.msra.gmra.mrb[0].mxu0 %v446_v27  ;;  %2272 = vmatmul.mubr.f32.vlgmr.msra.gmra.mrb[0].mxu1 %v449_v43 }
  0xa3   : > { %2470 = vmatpush3.bf16.msra.mxu0 %v3210_v13  ;;  %2454 = vmatpush3.bf16.msra.mxu1 %v2451_v41 }
  0xa4   : > { %2472 = vmatprep.subr.bf16.mxu0 %v3212_v17  ;;  %2304 = vmatprep.mubr.f32.mxu0 %v437_v31 }
  0xa5   : > { %2456 = vmatprep.subr.bf16.mxu1 %v2455_v44  ;;  %2282 = vmatprep.mubr.f32.mxu1 %v435_v19 }
  0xa7   : > { %2474 = vmatpush3.bf16.msra.mxu0 %v3212_v17  ;;  %2458 = vmatpush3.bf16.msra.mxu1 %v2455_v44 }
  0xa8   : > { %2476 = vmatprep.subr.bf16.mxu0 %v2475_v45  ;;  %2329 = vmatprep.subr.bf16.mxu1 %v2920_v47 }
  0xaa   : > { %2305 = vmatmul.mubr.f32.vlgmr.msra.gmra.mrb[0].mxu0 %v447_v32  ;;  %2283 = vmatmul.mubr.f32.vlgmr.msra.gmra.mrb[0].mxu1 %v445_v20 }
  0xab   : > { %2478 = vmatpush3.bf16.msra.mxu0 %v2475_v45  ;;  %2315 = vmatprep.mubr.f32.mxu0 %v435_v19 }
  0xac   : > { %2480 = vmatprep.subr.bf16.mxu0 %v2479_v46  ;;  %2331 = vmatprep.mubr.msk.bf16.mxu1 %vm2921_vm3, %v2920_v47 }
  0xaf   : > { %2482 = vmatpush3.bf16.msra.mxu0 %v2479_v46 }
  0xb0   : > { %2484 = vmatprep.subr.bf16.mxu0 %v3210_v13 }
  0xb2   : > { %2316 = vmatmul.mubr.f32.vlgmr.msra.gmra.mrb[0].mxu0 %v445_v20 }
  0xb3   : > { %2486 = vmatpush3.bf16.msra.mxu0 %v3210_v13  ;;  %2326 = vmatprep.mubr.f32.mxu0 %v435_v19 }
  0xb4   : > { %2488 = vmatprep.subr.bf16.mxu0 %v3212_v17 }
  0xb7   : > { %2490 = vmatpush3.bf16.msra.mxu0 %v3212_v17 }
  0xb8   : > { %2365 = vmatprep.subr.bf16.mxu0 %v2920_v47 }
  0xba   : > { %2327 = vmatmul.mubr.f32.vlgmr.msra.gmra.mrb[0].mxu0 %v445_v20 }
  0xbb   : > { %2367 = vmatprep.mubr.msk.bf16.mxu0 %vm2921_vm3, %v2920_v47 }
 0x17d   : > { %v2284_v48 = vpop.f32.mrb[0].mxu1 }
 0x17e   : > { %v542_v49 = vpop.f32.mrb[1].mxu1  ;;  %v2539_v51 = vadd.f32 %v2284_v48, %v2143_v50 }
 0x17f   : > { %v2541_v52 = vadd.f32 %v2143_v50, %v542_v49 }
 0x18d   : > { %v2328_v53 = vpop.f32.mrb[0].mxu0 }
 0x18e   : > { %v2540_v55 = vadd.f32 %v2539_v51, %v2328_v53  ;;  %v884_v56 = vpop.f32.mrb[1].mxu0  ;;  %v1376_v53 = vld [vmem:[#allocation10] sm:$0xff] }
 0x18f   : > { %v2542_v58 = vadd.f32 %v2541_v52, %v884_v56 }
 0x190   : > { %v897_v59 = vsub.f32 %v2540_v55, %v895_v54  ;;  %v1394_v55 = vand.u32 4294901760, %v1376_v53 }
 0x191   : > { %v896_v60 = vsub.f32 %v2542_v58, %v894_v57 }
 0x192   : > { %v899_v61 = vmul.f32 0.5, %v897_v59  ;;  %v1378_v59 = vld [vmem:[#allocation10 + $0x10] sm:$0xff] }
 0x193   : > { %v898_v62 = vmul.f32 0.5, %v896_v60  ;;  %v1379_v60 = vld [vmem:[#allocation10 + $0x18] sm:$0xff] }
 0x194   : > { %v901_v63 = vadd.f32 %v899_v61, %v895_v54  ;;  %v1377_v54 = vld [vmem:[#allocation10 + $0x8] sm:$0xff] }
 0x195   : > { %v900_v0 = vadd.f32 %v898_v62, %v894_v57  ;;  %v1397_v56 = vand.u32 4294901760, %v1377_v54  ;;  %v1484_v57 = vsub.f32 %v1376_v53, %v1394_v55 }
 0x196   : > { %vm903_vm4 = vcmp.ge.f32.partialorder %v901_v63, 1.0 }
 0x197   : > { %v3236_v1 = vsel %vm903_vm4, 1.0, %v2920_v47  ;;  %vm902_vm5 = vcmp.ge.f32.partialorder %v900_v0, 1.0  ;;  %v1491_v58 = vsub.f32 %v1377_v54, %v1397_v56  ;;  %v1485_v61 = vand.u32 4294901760, %v1484_v57 }
 0x198   : > { %v909_v2 = vsub.f32 1.0, %v3236_v1  ;;  %v3240_v3 = vsel %vm902_vm5, 1.0, %v2920_v47 }
 0x199   : > { %v908_v4 = vsub.f32 1.0, %v3240_v3  ;;  %v925_v5 = vpack.c.bf16 %v3236_v1, %v3240_v3  ;;  %v2687_v6 = vpack.i.bf16 %v3236_v1, %v3240_v3  ;;  %v1492_v62 = vand.u32 4294901760, %v1491_v58  ;;  %v1356_v3 = vld [vmem:[#allocation3] sm:$0xff] }
 0x19a   : > { %v911_v7 = vmul.f32 %v909_v2, %v901_v63  ;;  %v1400_v63 = vand.u32 4294901760, %v1378_v59  ;;  %v1486_v2 = vsub.f32 %v1484_v57, %v1485_v61 }
 0x19b   : > { %v910_v8 = vmul.f32 %v908_v4, %v900_v0  ;;  %1028 = vrot.lane.b32.xlu1 %v925_v5, %s2922_s8  ;;  %927 = vrot.lane.b32.xlu0 %v925_v5, %s2923_s17  ;;  %v1403_v0 = vand.u32 4294901760, %v1379_v60  ;;  %v1493_v4 = vsub.f32 %v1491_v58, %v1492_v62  ;;  %s3336_s8 = sadd.s32 %s2168_s9, %s2167_s7 }
 0x19c   : > { %914 = vst.msk [vmem:[#allocation2 + $0x8] sm:$0xff] %vm912_vm6, %v911_v7  ;;  %s2169_s17 = sshll.u32 %s3336_s8, 7 }
 0x19d   : > { %913 = vst.msk [vmem:[#allocation2] sm:$0xff] %vm912_vm6, %v910_v8  ;;  %v1505_v7 = vsub.f32 %v1379_v60, %v1403_v0  ;;  %v1487_v8 = vand.u32 4294901760, %v1486_v2 }
 0x19f   : > { %1026 = vrot.lane.b32.xlu1 %v925_v5, %s2924_s10  ;;  %978 = vrot.lane.b32.xlu0 %v925_v5, %s2925_s19 }
 0x1a3   : > { %1127 = vrot.lane.b32.xlu1 %v925_v5, %s2926_s29  ;;  %1078 = vrot.lane.b32.xlu0 %v925_v5, %s2927_s30  ;;  %s3495_s29 = sld [smem:[#allocation25_spill]] }
 0x1a7   : > { %1226 = vrot.lane.b32.xlu1 %v925_v5, %s2928_s12  ;;  %1125 = vrot.lane.b32.xlu0 %v925_v5, %s2929_s15  ;;  %s1982_s12 = sshll.u32 %s3205_s11, 4  ;;  %s1949_s15 = scalar_lea.sflag [#allocation13], %s3186_s18  ;;  %s3347_s12 = int_to_ptr.vmem [resolvable:$true] %s1982_s12 }
 0x1a8   : > { %s2778_s25 = scalar_lea.vmem %s3347_s12, 256 }
 0x1a9   : > { %s3344_s30 = scalar_lea.hbm %s3495_s29, %s2169_s17  ;;  %p2779_p10 = scmp.ne.s32.totalorder %s3347_s12, %s2778_s25 }
 0x1ab   : > { %1177 = vrot.lane.b32.xlu1 %v925_v5, %s2930_s13  ;;  %1224 = vrot.lane.b32.xlu0 %v925_v5, %s2931_s5  ;;  %p2780_p6 = pnand %p2779_p10, %p3122_p8  ;;  %s2782_s13 = sshll.u32 %s2936_s24, 4  ;;  %s2783_s13 = int_to_ptr.vmem [resolvable:$false] %s2782_s13 }
 0x1ac   : > { %s2784_s5 = scalar_lea.vmem %s2783_s13, 512  ;;  %p2785_p13 = scmp.lt.s32.totalorder %s3347_s12, %s2783_s13 }
 0x1ad   : > { %p2781_p11 = pneg %p2780_p6  ;;  %p2786_p3 = scmp.lt.s32.totalorder %s2784_s5, %s2778_s25 }
 0x1af   : > { %1276 = vrot.lane.b32.xlu0 %v925_v5, %s2932_s21  ;;  %p2787_p7 = por %p2786_p3, %p2785_p13 }
 0x1b1   : > { %p2788_p12 = pnand %p2787_p7, %p2781_p11 }
 0x20d   : > { %v1029_v9 = vpop.permute.xlu1 %1028  ;;  %v928_v10 = vpop.permute.xlu0 %927 }
 0x20e   : > { %v934_v11 = vsel %vm929_vm7, %v928_v10, 0  ;;  %v1034_v25 = vsel %vm929_vm7, %v1029_v9, 0  ;;  %v1494_v9 = vand.u32 4294901760, %v1493_v4 }
 0x20f   : > { %2330 = vmatpush3.bf16.xpose.msra.mxu1 %v934_v11  ;;  %v1506_v11 = vand.u32 4294901760, %v1505_v7 }
 0x210   : > { %2335 = vmatprep.subr.bf16.mxu1 %v2920_v47 }
 0x211   : > { %v1027_v12 = vpop.permute.xlu1 %1026  ;;  %v979_v13 = vpop.permute.xlu0 %978 }
 0x215   : > { %v1128_v14 = vpop.permute.xlu1 %1127  ;;  %v1079_v15 = vpop.permute.xlu0 %1078 }
 0x216   : > { %2332 = vmatmul.mubr.msk.bf16.vlgmr.msra.gmra.mrb[4].mxu1 %vm929_vm7, %v925_v5  ;;  %v1133_v40 = vsel %vm929_vm7, %v1128_v14, 0  ;;  %v1498_v5 = vsub.f32 %v1378_v59, %v1400_v63 }
 0x217   : > { %2336 = vmatpush3.bf16.msra.mxu1 %v979_v13  ;;  %2337 = vmatprep.mubr.msk.bf16.mxu1 %vm2921_vm3, %v2920_v47  ;;  %v2499_v13 = vpack.c.bf16 %v1494_v9, %v1487_v8 }
 0x218   : > { %2341 = vmatprep.subr.bf16.mxu1 %v2920_v47  ;;  %v1499_v10 = vand.u32 4294901760, %v1498_v5 }
 0x219   : > { %v1227_v16 = vpop.permute.xlu1 %1226  ;;  %v1126_v18 = vpop.permute.xlu0 %1125 }
 0x21a   : > { %v1232_v17 = vsel %vm929_vm7, %v1227_v16, 0  ;;  %v1500_v14 = vsub.f32 %v1498_v5, %v1499_v10 }
 0x21b   : > { %2366 = vmatpush3.bf16.xpose.msra.mxu0 %v1232_v17 }
 0x21c   : > { %2500 = vmatprep.subr.bf16.mxu0 %v2499_v13 }
 0x21d   : > { %v1225_v19 = vpop.permute.xlu0 %1224  ;;  %v1178_v41 = vpop.permute.xlu1 %1177 }
 0x221   : > { %v1277_v52 = vpop.permute.xlu0 %1276 }
 0x222   : > { %2368 = vmatmul.mubr.msk.bf16.vlgmr.msra.gmra.mrb[4].mxu0 %vm929_vm7, %v1225_v19 }
 0x223   : > { %2502 = vmatpush3.bf16.msra.mxu0 %v2499_v13 }
 0x2e9   : > { %v970_v20 = vpop.f32.mrb[4].mxu1 }
 0x2ea   : > { %v2333_v21 = vpop.f32.mrb[5].mxu1 }
 0x2eb   : > { %v973_v22 = vpop.f32.mrb[6].mxu1 }
 0x2ec   : > { %v977_v23 = vpack.c.bf16 %v973_v22, %v970_v20  ;;  %v2334_v24 = vpop.f32.mrb[7].mxu1  ;;  %v3284_v22 = vpack.c.bf16 %v1397_v56, %v1394_v55 }
 0x2ee   : > { %2338 = vmatmul.mubr.msk.bf16.vlgmr.msra.gmra.mrb[8].mxu1 %vm981_vm8, %v977_v23  ;;  %v3286_v23 = vpack.c.bf16 %v1403_v0, %v1400_v63 }
 0x2ef   : > { %2342 = vmatpush3.bf16.xpose.msra.mxu1 %v1034_v25  ;;  %2343 = vmatprep.mubr.msk.bf16.mxu1 %vm2921_vm3, %v2920_v47  ;;  %v2507_v25 = vpack.c.bf16 %v1491_v58, %v1484_v57 }
 0x2f0   : > { %2347 = vmatprep.subr.bf16.mxu1 %v2920_v47 }
 0x2f5   : > { %v1268_v26 = vpop.f32.mrb[4].mxu0 }
 0x2f6   : > { %2344 = vmatmul.mubr.msk.bf16.vlgmr.msra.gmra.mrb[12].mxu1 %vm929_vm7, %v1027_v12  ;;  %v2369_v27 = vpop.f32.mrb[5].mxu0 }
 0x2f7   : > { %2348 = vmatpush3.bf16.msra.mxu1 %v1079_v15  ;;  %v1271_v28 = vpop.f32.mrb[6].mxu0  ;;  %2349 = vmatprep.mubr.msk.bf16.mxu1 %vm2921_vm3, %v2920_v47  ;;  %v1507_v15 = vsub.f32 %v1505_v7, %v1506_v11 }
 0x2f8   : > { %v1275_v29 = vpack.c.bf16 %v1271_v28, %v1268_v26  ;;  %v2370_v30 = vpop.f32.mrb[7].mxu0  ;;  %2353 = vmatprep.subr.bf16.mxu1 %v2920_v47 }
 0x2f9   : > { %v1508_v19 = vand.u32 4294901760, %v1507_v15  ;;  %v3296_v30 = vpack.c.bf16 %v1492_v62, %v1485_v61 }
 0x3c1   : > { %v3265_v31 = vpop.f32.mrb[8].mxu1 }
 0x3c2   : > { %v2339_v32 = vpop.f32.mrb[9].mxu1 }
 0x3c3   : > { %v3267_v33 = vpop.f32.mrb[10].mxu1  ;;  %v3298_v32 = vpack.c.bf16 %v1506_v11, %v1499_v10 }
 0x3c4   : > { %v2340_v34 = vpop.f32.mrb[11].mxu1 }
 0x3c9   : > { %v1070_v35 = vpop.f32.mrb[12].mxu1 }
 0x3ca   : > { %v2345_v36 = vpop.f32.mrb[13].mxu1 }
 0x3cb   : > { %v1073_v37 = vpop.f32.mrb[14].mxu1 }
 0x3cc   : > { %v1077_v38 = vpack.c.bf16 %v1073_v37, %v1070_v35  ;;  %v2346_v39 = vpop.f32.mrb[15].mxu1 }
 0x3ce   : > { %2350 = vmatmul.mubr.msk.bf16.vlgmr.msra.gmra.mrb[16].mxu1 %vm981_vm8, %v1077_v38 }
 0x3cf   : > { %2354 = vmatpush3.bf16.xpose.msra.mxu1 %v1133_v40  ;;  %2355 = vmatprep.mubr.msk.bf16.mxu1 %vm2921_vm3, %v2920_v47 }
 0x3d0   : > { %2359 = vmatprep.subr.bf16.mxu1 %v2920_v47 }
 0x3d6   : > { %2356 = vmatmul.mubr.msk.bf16.vlgmr.msra.gmra.mrb[20].mxu1 %vm929_vm7, %v1126_v18  ;;  %v1501_v18 = vand.u32 4294901760, %v1500_v14 }
 0x3d7   : > { %2360 = vmatpush3.bf16.msra.mxu1 %v1178_v41  ;;  %2361 = vmatprep.mubr.msk.bf16.mxu1 %vm2921_vm3, %v2920_v47 }
 0x3d8   : > { %2371 = vmatprep.subr.bf16.mxu1 %v2920_v47  ;;  %v2503_v21 = vpack.c.bf16 %v1508_v19, %v1501_v18 }
 0x3da   : > { %2504 = vmatprep.subr.bf16.mxu0 %v2503_v21 }
 0x3db   : > { %2506 = vmatpush3.bf16.msra.mxu0 %v2503_v21 }
 0x3dc   : > { %2508 = vmatprep.subr.bf16.mxu0 %v2507_v25 }
 0x4a1   : > { %v1118_v42 = vpop.f32.mrb[16].mxu1 }
 0x4a2   : > { %1325 = vrot.lane.b32.xlu1 %v1118_v42, %s2933_s3  ;;  %v2351_v43 = vpop.f32.mrb[17].mxu1 }
 0x4a3   : > { %v1121_v44 = vpop.f32.mrb[18].mxu1 }
 0x4a4   : > { %1327 = vrot.lane.b32.xlu0 %v1121_v44, %s2933_s3  ;;  %v2352_v45 = vpop.f32.mrb[19].mxu1  ;;  %v1357_v44 = vld [vmem:[#allocation3 + $0x8] sm:$0xff] }
 0x4a9   : > { %v1169_v46 = vpop.f32.mrb[20].mxu1 }
 0x4aa   : > { %v2357_v48 = vpop.f32.mrb[21].mxu1 }
 0x4ab   : > { %v1172_v49 = vpop.f32.mrb[22].mxu1 }
 0x4ac   : > { %v1176_v50 = vpack.c.bf16 %v1172_v49, %v1169_v46  ;;  %v2358_v51 = vpop.f32.mrb[23].mxu1 }
 0x4ae   : > { %2362 = vmatmul.mubr.msk.bf16.vlgmr.msra.gmra.mrb[24].mxu1 %vm981_vm8, %v1176_v50 }
 0x4af   : > { %2372 = vmatpush3.bf16.msra.mxu1 %v1277_v52  ;;  %2373 = vmatprep.mubr.msk.bf16.mxu1 %vm2921_vm3, %v2920_v47 }
 0x4b0   : > { %2492 = vmatprep.subr.bf16.mxu1 %v3284_v22 }
 0x4b6   : > { %2374 = vmatmul.mubr.msk.bf16.vlgmr.msra.gmra.mrb[28].mxu1 %vm981_vm8, %v1275_v29  ;;  %v2511_v29 = vpack.c.bf16 %v1505_v7, %v1498_v5 }
 0x4b7   : > { %2494 = vmatpush3.bf16.msra.mxu1 %v3284_v22 }
 0x4b8   : > { %2496 = vmatprep.subr.bf16.mxu1 %v3286_v23 }
 0x4bb   : > { %2498 = vmatpush3.bf16.msra.mxu1 %v3286_v23 }
 0x514   : > { %v1326_v34 = vpop.permute.xlu1 %1325 }
 0x515   : > { %v1347_v38 = vsel %vm929_vm7, %v3265_v31, %v1326_v34 }
 0x516   : > { %v1328_v35 = vpop.permute.xlu0 %1327 }
 0x517   : > { %v1348_v1 = vsel %vm929_vm7, %v3267_v33, %v1328_v35 }
 0x581   : > { %v1217_v12 = vpop.f32.mrb[24].mxu1 }
 0x582   : > { %1333 = vrot.lane.b32.xlu1 %v1217_v12, %s2934_s20  ;;  %v2363_v16 = vpop.f32.mrb[25].mxu1 }
 0x583   : > { %v1220_v17 = vpop.f32.mrb[26].mxu1 }
 0x584   : > { %1335 = vrot.lane.b32.xlu0 %v1220_v17, %s2934_s20  ;;  %v2364_v20 = vpop.f32.mrb[27].mxu1 }
 0x589   : > { %v1316_v24 = vpop.f32.mrb[28].mxu1 }
 0x58a   : > { %1341 = vrot.lane.b32.xlu1 %v1316_v24, %s2935_s4  ;;  %v2375_v26 = vpop.f32.mrb[29].mxu1 }
 0x58b   : > { %v1319_v27 = vpop.f32.mrb[30].mxu1 }
 0x58c   : > { %1343 = vrot.lane.b32.xlu0 %v1319_v27, %s2935_s4  ;;  %v2376_v28 = vpop.f32.mrb[31].mxu1 }
 0x58e   : > { %2688 = vrot.lane.b32.xlu1 %v2687_v6, %s2925_s19 }
 0x5f4   : > { %v1334_v36 = vpop.permute.xlu1 %1333 }
 0x5f5   : > { %v1349_v39 = vsel %vm981_vm8, %v1347_v38, %v1334_v36 }
 0x5f6   : > { %v1336_v37 = vpop.permute.xlu0 %1335 }
 0x5f7   : > { %v1350_v41 = vsel %vm981_vm8, %v1348_v1, %v1336_v37 }
 0x5fc   : > { %v1342_v40 = vpop.permute.xlu1 %1341 }
 0x5fd   : > { %v1352_v6 = vsel %vm1351_vm9, %v1349_v39, %v1342_v40 }
 0x5fe   : > { %v1354_v42 = vmul.f32 0.125, %v1352_v6  ;;  %v1344_v43 = vpop.permute.xlu0 %1343 }
 0x5ff   : > { %v1353_v45 = vsel %vm1351_vm9, %v1350_v41, %v1344_v43 }
 0x600   : > { %v1358_v46 = vsub.f32 %v1354_v42, %v1356_v3  ;;  %v1355_v48 = vmul.f32 0.125, %v1353_v45  ;;  %v2689_v49 = vpop.permute.xlu1 %2688 }
 0x601   : > { %v2691_v31 = vunpack.i.h.bf16 %v2689_v49  ;;  %v2690_v50 = vunpack.i.l.bf16 %v2689_v49 }
 0x602   : > { %v1360_v51 = vmul.f32 0.5, %v1358_v46  ;;  %v1359_v52 = vsub.f32 %v1355_v48, %v1357_v44 }
 0x603   : > { %924 = vst.msk [vmem:[%s3205_s11 + $0x8] sm:$0xff] %vm359_vm2, %v2691_v31  ;;  %923 = vst.msk [vmem:[%s3205_s11] sm:$0xff] %vm359_vm2, %v2690_v50 }
 0x604   : > { %v1362_v33 = vadd.f32 %v1360_v51, %v1356_v3  ;;  %v1361_v53 = vmul.f32 0.5, %v1359_v52 }
 0x606   : > { %v1363_v54 = vadd.f32 %v1361_v53, %v1357_v44  ;;  %vm1364_vm10 = vcmp.ge.f32.partialorder %v1362_v33, 0.5 }
 0x607   : > { %v2154_v55 = vsel %vm1364_vm10, 1.0, %v2920_v47 }
 0x608   : > { %v1370_v56 = vsub.f32 1.0, %v2154_v55  ;;  %2396 = vmatprep.mubr.msk.f32.mxu0 %vm359_vm2, %v2154_v55  ;;  %vm1365_vm11 = vcmp.ge.f32.partialorder %v1363_v54, 0.5  ;;  %v1388_v57 = vsel %vm359_vm2, %v2154_v55, 0 }
 0x609   : > { %v2155_v58 = vsel %vm1365_vm11, 1.0, %v2920_v47  ;;  %v1463_v59 = vsub.f32 %v1388_v57, %v1388_v57 }
 0x60a   : > { %v1372_v60 = vmul.f32 %v1370_v56, %v1362_v33  ;;  %v1371_v61 = vsub.f32 1.0, %v2155_v58  ;;  %2397 = vmatmul.mubr.msk.f32.vlgmr.msra.gmra.mrb[2].mxu0 %vm359_vm2, %v2155_v58  ;;  %v1391_v62 = vsel %vm359_vm2, %v2155_v58, 0 }
 0x60b   : > { %2510 = vmatpush3.bf16.msra.mxu0 %v2507_v25  ;;  %2407 = vmatprep.mubr.f32.mxu0 %v1463_v59  ;;  %v1464_v63 = vand.u32 4294901760, %v1463_v59  ;;  %v1473_v0 = vsub.f32 %v1391_v62, %v1391_v62 }
 0x60c   : > { %1374 = vst.msk [vmem:[#allocation3] sm:$0xff] %vm359_vm2, %v1372_v60  ;;  %v1373_v2 = vmul.f32 %v1371_v61, %v1363_v54  ;;  %2512 = vmatprep.subr.bf16.mxu0 %v2511_v29 }
 0x60d   : > { %v1465_v4 = vsub.f32 %v1463_v59, %v1464_v63  ;;  %v1474_v5 = vand.u32 4294901760, %v1473_v0 }
 0x60e   : > { %1375 = vst.msk [vmem:[#allocation3 + $0x8] sm:$0xff] %vm359_vm2, %v1373_v2 }
 0x60f   : > { %2514 = vmatpush3.bf16.msra.mxu0 %v2511_v29  ;;  %v1466_v7 = vand.u32 4294901760, %v1465_v4  ;;  %v1475_v8 = vsub.f32 %v1473_v0, %v1474_v5 }
 0x610   : > { %2516 = vmatprep.subr.bf16.mxu0 %v3284_v22 }
 0x611   : > { %2385 = vmatprep.mubr.f32.mxu1 %v1466_v7  ;;  %v1476_v9 = vand.u32 4294901760, %v1475_v8 }
 0x612   : > { %2408 = vmatmul.mubr.f32.vlgmr.msra.gmra.mrb[2].mxu0 %v1473_v0 }
 0x613   : > { %2386 = vmatmul.mubr.f32.vlgmr.msra.gmra.mrb[2].mxu1 %v1476_v9  ;;  %2518 = vmatpush3.bf16.msra.mxu0 %v3284_v22 }
 0x614   : > { %2418 = vmatprep.mubr.f32.mxu0 %v1464_v63  ;;  %2520 = vmatprep.subr.bf16.mxu0 %v3286_v23 }
 0x617   : > { %2522 = vmatpush3.bf16.msra.mxu0 %v3286_v23 }
 0x618   : > { %2524 = vmatprep.subr.bf16.mxu0 %v3296_v30 }
 0x61a   : > { %2419 = vmatmul.mubr.f32.vlgmr.msra.gmra.mrb[2].mxu0 %v1474_v5 }
 0x61b   : > { %2526 = vmatpush3.bf16.msra.mxu0 %v3296_v30  ;;  %2429 = vmatprep.mubr.msk.f32.mxu0 %vm359_vm2, %v2154_v55 }
 0x61c   : > { %2528 = vmatprep.subr.bf16.mxu0 %v3298_v32 }
 0x61f   : > { %2530 = vmatpush3.bf16.msra.mxu0 %v3298_v32 }
 0x620   : > { %2532 = vmatprep.subr.bf16.mxu0 %v3284_v22 }
 0x622   : > { %2430 = vmatmul.mubr.msk.f32.vlgmr.msra.gmra.mrb[2].mxu0 %vm359_vm2, %v2155_v58 }
 0x623   : > { %2534 = vmatpush3.bf16.msra.mxu0 %v3284_v22  ;;  %2440 = vmatprep.mubr.msk.f32.mxu0 %vm359_vm2, %v2154_v55 }
 0x624   : > { %2536 = vmatprep.subr.bf16.mxu0 %v3286_v23 }
 0x627   : > { %2538 = vmatpush3.bf16.msra.mxu0 %v3286_v23 }
 0x62a   : > { %2441 = vmatmul.mubr.msk.f32.vlgmr.msra.gmra.mrb[2].mxu0 %vm359_vm2, %v2155_v58 }
 0x62b   : > { %2791 = shalt.err (!%p2788_p12)
}
 0x62c   : > { %s2792_s11 = scalar_lea.hbm %s3344_s30, 256  ;;  %s2796_s4 = scalar_lea.hbm %s3495_s29, 2048 }
 0x62d   : > { %p2793_p1 = scmp.ne.s32.totalorder %s3344_s30, %s2792_s11  ;;  %p2797_p9 = scmp.lt.u32.totalorder %s3344_s30, %s3495_s29 }
 0x62e   : > { %p2798_p0 = scmp.lt.u32.totalorder %s2796_s4, %s2792_s11  ;;  %p2800_p10 = scmp.lt.u32.totalorder %s2792_s11, %s3344_s30 }
 0x62f   : > { %p2794_p2 = pnand %p2793_p1, %p3122_p8 }
 0x630   : > { %p2799_p4 = por %p2798_p0, %p2797_p9 }
 0x631   : > { %p2795_p5 = pneg %p2794_p2 }
 0x632   : > { %p2801_p6 = por %p2800_p10, %p2799_p4 }
 0x634   : > { %p2802_p11 = pnand %p2801_p6, %p2795_p5 }
 0x636   : > { %2805 = shalt.err (!%p2802_p11)
}
 0x637   : > { %s2937_s10 = smov 128   ;;  %s3496_s24 = sld [smem:[#allocation23_spill]]  ;;  %v1922_v16 = vld [vmem:[#allocation4 + $0x8] sm:$0xff]  ;;  %v1921_v19 = vld [vmem:[#allocation4] sm:$0xff] }
 0x638   : > { %2574 = dma.vmem_to_hbm [thread:$0]  (%p3122_p8), %s3347_s12, 256, %s3344_s30, %s1949_s15, %s2937_s10, %s2937_s10, %s2933_s3  }
 0x639   : > { %s1964_s30 = sshll.u32 %s3202_s6, 4  ;;  %s3497_s13 = sld [smem:[#allocation24_spill]]  ;;  %s3388_s30 = int_to_ptr.vmem [resolvable:$true] %s1964_s30 }
 0x63a   : > { %s1944_s8 = scalar_lea.sflag [#allocation7], %s3186_s18  ;;  %s2806_s11 = scalar_lea.vmem %s3388_s30, 256 }
 0x63b   : > { %p2807_p13 = scmp.ne.s32.totalorder %s3388_s30, %s2806_s11 }
 0x63d   : > { %v2156_v12 = vld [vmem:[%s3496_s24] ss:$0 sm:$0xff]  ;;  %p2808_p3 = pnand %p2807_p13, %p3122_p8 }
 0x63f   : > { %s3386_s5 = scalar_lea.hbm %s3497_s13, %s2169_s17  ;;  %p2809_p7 = pneg %p2808_p3 }
 0x640   : > { %s2938_s17 = smov [#allocation11]  }
 0x641   : > { %s2810_s21 = sshll.u32 %s2938_s17, 4  ;;  %s2811_s21 = int_to_ptr.vmem [resolvable:$false] %s2810_s21 }
 0x642   : > { %s2812_s20 = scalar_lea.vmem %s2811_s21, 512  ;;  %p2813_p12 = scmp.lt.s32.totalorder %s3388_s30, %s2811_s21 }
 0x643   : > { %p2814_p1 = scmp.lt.s32.totalorder %s2812_s20, %s2806_s11 }
 0x645   : > { %p2815_p2 = por %p2814_p1, %p2813_p12 }
 0x647   : > { %p2816_p5 = pnand %p2815_p2, %p2809_p7 }
 0x6e6   : > { %v2387_v10 = vpop.f32.mrb[2].mxu1 }
 0x6e7   : > { %v1468_v11 = vpop.f32.mrb[3].mxu1  ;;  %v1479_v13 = vadd.f32 %v2387_v10, %v2156_v12 }
 0x6e8   : > { %v1469_v14 = vadd.f32 %v2156_v12, %v1468_v11 }
 0x6fd   : > { %v2442_v15 = vpop.f32.mrb[2].mxu0 }
 0x6fe   : > { %v2544_v17 = vadd.f32 %v2442_v15, %v1479_v13  ;;  %v1911_v18 = vpop.f32.mrb[3].mxu0 }
 0x6ff   : > { %v2546_v20 = vadd.f32 %v1911_v18, %v1469_v14 }
 0x700   : > { %v1924_v21 = vsub.f32 %v2544_v17, %v1922_v16 }
 0x701   : > { %v1923_v22 = vsub.f32 %v2546_v20, %v1921_v19 }
 0x702   : > { %v1926_v23 = vmul.f32 0.5, %v1924_v21 }
 0x703   : > { %v1925_v24 = vmul.f32 0.5, %v1923_v22 }
 0x704   : > { %v1928_v25 = vadd.f32 %v1926_v23, %v1922_v16 }
 0x705   : > { %v1927_v26 = vadd.f32 %v1925_v24, %v1921_v19 }
 0x706   : > { %vm1930_vm12 = vcmp.ge.f32.partialorder %v1928_v25, 1.0 }
 0x707   : > { %v2164_v27 = vsel %vm1930_vm12, 1.0, %v2920_v47  ;;  %vm1929_vm13 = vcmp.ge.f32.partialorder %v1927_v26, 1.0 }
 0x708   : > { %v1936_v28 = vsub.f32 1.0, %v2164_v27  ;;  %1942 = vst.msk [vmem:[%s3202_s6 + $0x8] sm:$0xff] %vm359_vm2, %v2164_v27  ;;  %v2163_v29 = vsel %vm1929_vm13, 1.0, %v2920_v47 }
 0x709   : > { %v1935_v30 = vsub.f32 1.0, %v2163_v29  ;;  %1941 = vst.msk [vmem:[%s3202_s6] sm:$0xff] %vm359_vm2, %v2163_v29 }
 0x70a   : > { %v1938_v32 = vmul.f32 %v1936_v28, %v1928_v25 }
 0x70b   : > { %2819 = shalt.err (!%p2816_p5)
}
 0x70c   : > { %s2820_s6 = scalar_lea.hbm %s3386_s5, 256  ;;  %s2824_s9 = scalar_lea.hbm %s3497_s13, 2048 }
 0x70d   : > { %p2821_p9 = scmp.ne.s32.totalorder %s3386_s5, %s2820_s6  ;;  %p2825_p10 = scmp.lt.u32.totalorder %s3386_s5, %s3497_s13 }
 0x70e   : > { %p2826_p6 = scmp.lt.u32.totalorder %s2824_s9, %s2820_s6  ;;  %p2828_p13 = scmp.lt.u32.totalorder %s2820_s6, %s3386_s5 }
 0x70f   : > { %p2822_p0 = pnand %p2821_p9, %p3122_p8 }
 0x710   : > { %p2827_p11 = por %p2826_p6, %p2825_p10 }
 0x711   : > { %p2823_p4 = pneg %p2822_p0 }
 0x712   : > { %p2829_p3 = por %p2828_p13, %p2827_p11 }
 0x714   : > { %p2830_p7 = pnand %p2829_p3, %p2823_p4 }
 0x716   : > { %2833 = shalt.err (!%p2830_p7)
}
 0x717   : > { %2573 = dma.vmem_to_hbm [thread:$0]  (%p3122_p8), %s3388_s30, 256, %s3386_s5, %s1944_s8, %s2937_s10, %s2937_s10, %s2933_s3   ;;  %v1937_v47 = vmul.f32 %v1935_v30, %v1927_v26  ;;  %1940 = vst.msk [vmem:[#allocation4 + $0x8] sm:$0xff] %vm359_vm2, %v1938_v32 }
 0x719   : > { %1939 = vst.msk [vmem:[#allocation4] sm:$0xff] %vm359_vm2, %v1937_v47 }
 0x71a PF: > { %s3498_s24 = sld [smem:[#allocation18_spill]]  ;;  %s3499_s12 = sld [smem:[#allocation19_spill]] }
 0x71b   : > { %p2600_p12 = scmp.ge.s32.totalorder %s2912_s28, 2 }
 0x720   : > { %s1997_s15 = sand.u32 1, %s3498_s24   ;;  %p3500_p1 = scmp.ne.s32.totalorder %s3499_s12, 0 }
 0x721   : > { %s1998_s16 = scalar_lea.sflag [#allocation7], %s1997_s15 }
 0x722   : > { %p2589_p2 = pnand %p2600_p12, %p3500_p1 }
 0x724   : > { %2875 = dma.done.wait (!%p2589_p2), %s1998_s16, 256  }
 0x725   : > { %2877 = vsyncadd (!%p2589_p2), %s1998_s16, 4294967040  ;;  %s2007_s18 = scalar_lea.sflag [#allocation13], %s1997_s15 }
 0x726   : > { %2879 = dma.done.wait (!%p2589_p2), %s2007_s18, 256  }
 0x727   : > { %2881 = vsyncadd (!%p2589_p2), %s2007_s18, 4294967040  ;;  %s27_s28 = sadd.s32 1, %s2912_s28   ;;  %s3501_s3 = sld [smem:[#allocation20_spill]] }
 0x728   : > { %p24_p8 = scmp.ge.s32.totalorder %s27_s28, 10   ;;  %s3502_s21 = smov %s2888_s22 }
 0x729   : > { %s3503_s22 = smov %s2892_s23  ;;  %s3504_s23 = smov %s3135_s1 }
 0x72a   : > { %s3505_s24 = smov %s2904_s26  ;;  %s3506_s25 = smov %s2908_s27 }
 0x72b   : > { %s3508_s27 = smov %s3514_s14  ;;  %26 = sbr.rel (!%p24_p8) target bundleno = 16 (0x10), region = 114 }
 0x72d   : > { %s3507_s26 = smov %s3501_s3 }
 0x732   :  { %2012 = vsyncpa [#allocation6], 1 }
 0x733   :  { %2014 = vsyncpa [#allocation6 + $0x1], 1 }
 0x734   :  { %2015 = vsyncpa [#allocation9], 1 }
 0x735   :  { %2016 = vsyncpa [#allocation7], 1 }
 0x736   :  { %2018 = vsyncpa [#allocation7 + $0x1], 1 }
 0x737   :  { %2019 = vsyncpa [#allocation13], 1 }
 0x738   :  { %2021 = vsyncpa [#allocation13 + $0x1], 1 }

</bundles_post_ra>
